<compile_context>
chip_gen: v6e
topology: v6e:2x2x1
jax: 0.10.0
libtpu: 0.0.40
codegen_flags: <defaults>
</compile_context>

<pallas_src>
import math
import jax
import jax.numpy as jnp
from jax.experimental import pallas as pl
from jax.experimental.pallas import tpu as pltpu

# ----------------------------------------------------------------------------
# Hyper-parameters (the EasyDict `args` of the PyTorch module), small shapes.
# ----------------------------------------------------------------------------
SFREQ = 128
POOLING_SIZE = 0.25
HOP_SIZE = 0.5
D = 8                 # args.D
C = 4                 # args.num_channels
NUM_CLASSES = 4       # args.num_classes
B = 2                 # batch
T = 128               # time samples

KERNEL_SIZE = int(SFREQ * 0.12)                        # 15
POOL_K = int(SFREQ * POOLING_SIZE)                     # 32
POOL_S = int(SFREQ * POOLING_SIZE * (1.0 - HOP_SIZE))  # 16
PAD_TOTAL = KERNEL_SIZE - 1
PAD_L = PAD_TOTAL // 2
PAD_R = PAD_TOTAL - PAD_L
T_PAD = T + PAD_TOTAL
T_POOL = (T - POOL_K) // POOL_S + 1                    # 7
OUTPUT_DIM = D * T_POOL                                # args.output_dim = 56
BN_EPS = 1e-5
CK = C * KERNEL_SIZE                                   # 60


# ----------------------------------------------------------------------------
# Pallas kernel: full fused forward, all B batch elements in one invocation.
# ----------------------------------------------------------------------------
def shallow_kernel(x_ref, wm_ref, pool_ref, g_ref, s2_ref, seg_ref, beff_ref,
                   o_ref):
    # merged temporal+spatial conv: (D, C*K) @ (C*K, B*T) -> (D, B*T)    [MXU]
    conv = jnp.dot(wm_ref[...], x_ref[...], preferred_element_type=jnp.float32)

    # square (VPU) -> overlapping mean pool, both batch elements at once, via
    # a block-diagonal pooling matrix with 1/POOL_K folded in:
    #   (D, B*T) @ (B*T, B*T_POOL)                                       [MXU]
    sq = conv * conv
    pooled = jnp.dot(sq, pool_ref[...], preferred_element_type=jnp.float32)

    # log(clamp(., 1e-6)); inference BatchNorm is folded into g_ref / beff_ref.
    act = jnp.log(jnp.maximum(pooled, 1e-6))                      # (D, B*T_POOL)

    # flatten + BN-affine + linear, all rank-2 (no in-kernel transpose):
    #   act_t[n*D+d, q]  = act[d, q]              (tile over classes, sublanes)
    #   prod             = act_t * G              (G holds scale[d] * W_lin)
    #   partial[n, q]    = sum_d prod[n*D+d, q]   (block-sum matmul over D)
    #   logits_T[n, b]   = sum_{q in batch b} partial[n, q]   (segment matmul)
    act_t = jnp.tile(act, (NUM_CLASSES, 1))                       # (NC*D, B*T_POOL)
    prod = act_t * g_ref[...]                                     # (NC*D, B*T_POOL)
    partial = jnp.dot(s2_ref[...], prod,
                      preferred_element_type=jnp.float32)         # (NC, B*T_POOL)
    logits_t = jnp.dot(partial, seg_ref[...],
                       preferred_element_type=jnp.float32)        # (NC, B)
    # TODO(synk): dropout is identity at inference; training-mode BatchNorm
    # batch statistics are not implemented (running stats are used, folded in).
    o_ref[...] = logits_t + beff_ref[...]                         # (NC, B)


# ----------------------------------------------------------------------------
# Wrapper: host glue (pad + im2col + lane-fold batch) + pallas_call
# ----------------------------------------------------------------------------
@jax.jit
def shallowconvnet_forward(x_nchw, params):
    """x_nchw: (B, 1, C, T) float32, same convention as the PyTorch module."""
    wm, pool_big, g_mat, s2, seg, beff = params

    x = x_nchw[:, 0, :, :]                                        # (B, C, T)
    x_pad = jnp.pad(x, ((0, 0), (0, 0), (PAD_L, PAD_R)))          # (B, C, T_PAD)
    # im2col: cols[b, c, k, t] = x_pad[b, c, t + k]
    cols = jnp.stack([x_pad[:, :, k:k + T] for k in range(KERNEL_SIZE)], axis=2)
    x_col = cols.reshape(B, CK, T)                                # (B, C*K, T)
    # fold batch onto the lane (time) axis: x_big[c*K+k, b*T+t]
    x_big = jnp.transpose(x_col, (1, 0, 2)).reshape(CK, B * T)    # (C*K, B*T)

    vmem_spec = pl.BlockSpec(memory_space=pltpu.MemorySpace.VMEM)
    out_t = pl.pallas_call(
        shallow_kernel,
        out_shape=jax.ShapeDtypeStruct((NUM_CLASSES, B), jnp.float32),
        in_specs=[vmem_spec] * 7,
        out_specs=vmem_spec,
    )(x_big, wm, pool_big, g_mat, s2, seg, beff)
    return out_t.T                                                # (B, NUM_CLASSES)


# ----------------------------------------------------------------------------
# Deterministic parameter init (synthetic; mimics the module's __init__ shapes)
# ----------------------------------------------------------------------------
def _renorm(w, max_norm=2.0):
    # torch.renorm(w, p=2, dim=0, maxnorm) as used by Conv2dWithConstraint
    flat = w.reshape(w.shape[0], -1)
    n = jnp.sqrt(jnp.sum(flat * flat, axis=1, keepdims=True))
    scale = jnp.where(n > max_norm, max_norm / (n + 1e-7), 1.0)
    return (flat * scale).reshape(w.shape)


def init_params(key):
    ks = jax.random.split(key, 8)
    w_temporal = _renorm(0.3 * jax.random.normal(ks[0], (D, 1, 1, KERNEL_SIZE), jnp.float32))
    w_spatial = _renorm(0.3 * jax.random.normal(ks[1], (D, D, C, 1), jnp.float32))
    bn_gamma = 1.0 + 0.1 * jax.random.normal(ks[2], (D,), jnp.float32)
    bn_beta = 0.1 * jax.random.normal(ks[3], (D,), jnp.float32)
    bn_mean = 0.1 * jax.random.normal(ks[4], (D,), jnp.float32)
    bn_var = jax.random.uniform(ks[5], (D,), jnp.float32, 0.5, 1.5)
    w_lin = jax.random.normal(ks[6], (NUM_CLASSES, OUTPUT_DIM), jnp.float32) / math.sqrt(OUTPUT_DIM)
    b_lin = 0.1 * jax.random.normal(ks[7], (NUM_CLASSES,), jnp.float32)
    return dict(w_temporal=w_temporal, w_spatial=w_spatial,
                bn_gamma=bn_gamma, bn_beta=bn_beta, bn_mean=bn_mean, bn_var=bn_var,
                w_lin=w_lin, b_lin=b_lin)


def pack_params_for_kernel(raw):
    f32 = jnp.float32
    # merged temporal+spatial conv weight: Wm[e, c*K+k] = sum_d ws[e,d,c]*wt[d,k]
    wt = raw["w_temporal"][:, 0, 0, :]                              # (D, K)
    ws = raw["w_spatial"][:, :, :, 0]                               # (D_out, D_in, C)
    wm = jnp.einsum("edc,dk->eck", ws, wt).reshape(D, CK)           # (D, C*K)

    # block-diagonal mean-pool matrix over the lane-folded (B*T) axis
    t_idx = jnp.arange(B * T)
    q_idx = jnp.arange(B * T_POOL)
    t_b, t_loc = t_idx // T, t_idx % T
    q_b, p_loc = q_idx // T_POOL, q_idx % T_POOL
    in_win = ((t_loc[:, None] >= p_loc[None, :] * POOL_S) &
              (t_loc[:, None] < p_loc[None, :] * POOL_S + POOL_K) &
              (t_b[:, None] == q_b[None, :]))
    pool_big = jnp.where(in_win, 1.0 / POOL_K, 0.0).astype(f32)     # (B*T, B*T_POOL)

    # inference BatchNorm folded into the linear layer
    scale = raw["bn_gamma"] / jnp.sqrt(raw["bn_var"] + BN_EPS)      # (D,)
    bnb = raw["bn_beta"] - raw["bn_mean"] * scale                   # (D,)
    wl3 = raw["w_lin"].reshape(NUM_CLASSES, D, T_POOL)              # [n, d, p]
    g_small = (wl3 * scale[None, :, None]).reshape(NUM_CLASSES * D, T_POOL)
    g_mat = jnp.tile(g_small, (1, B)).astype(f32)                   # (NC*D, B*T_POOL)
    # block-sum matrix over d:   S2[n, n'*D+d] = 1 iff n' == n
    s2 = jnp.repeat(jnp.eye(NUM_CLASSES, dtype=f32), D, axis=1)     # (NC, NC*D)
    # batch-segment-sum matrix:  seg[b*T_POOL+p, b] = 1
    seg = (q_idx[:, None] // T_POOL == jnp.arange(B)[None, :]).astype(f32)  # (B*T_POOL, B)
    # effective bias: linear bias + contribution of the folded BN shift
    beff = (raw["b_lin"] + jnp.einsum("ndp,d->n", wl3, bnb)).reshape(NUM_CLASSES, 1)
    return (wm.astype(f32), pool_big, g_mat, s2, seg, beff.astype(f32))


# ----------------------------------------------------------------------------
# Pure-JAX reference (mirrors the PyTorch forward) for sanity checking
# ----------------------------------------------------------------------------
def reference_forward(x_nchw, raw):
    x = x_nchw[:, 0, :, :]
    xp = jnp.pad(x, ((0, 0), (0, 0), (PAD_L, PAD_R)))
    wt = raw["w_temporal"][:, 0, 0, :]                              # (D, K)
    windows = jnp.stack([xp[:, :, k:k + T] for k in range(KERNEL_SIZE)], axis=-1)  # (B,C,T,K)
    temporal = jnp.einsum("dk,bctk->bdct", wt, windows)
    spatial = jnp.einsum("edc,bdct->bet", raw["w_spatial"][:, :, :, 0], temporal)   # (B,D,T)
    sq = spatial * spatial
    pooled = jnp.stack(
        [sq[:, :, p * POOL_S:p * POOL_S + POOL_K].mean(axis=-1) for p in range(T_POOL)],
        axis=-1)                                                                     # (B,D,T_POOL)
    act = jnp.log(jnp.maximum(pooled, 1e-6))
    g = raw["bn_gamma"][None, :, None]
    be = raw["bn_beta"][None, :, None]
    mu = raw["bn_mean"][None, :, None]
    var = raw["bn_var"][None, :, None]
    normed = (act - mu) / jnp.sqrt(var + BN_EPS) * g + be
    flat = normed.reshape(B, D * T_POOL)
    return flat @ raw["w_lin"].T + raw["b_lin"][None, :]


if __name__ == "__main__":
    key = jax.random.PRNGKey(0)
    k_param, k_x = jax.random.split(key)
    raw = init_params(k_param)
    params = pack_params_for_kernel(raw)
    x = jax.random.normal(k_x, (B, 1, C, T), jnp.float32)

    out = jax.block_until_ready(shallowconvnet_forward(x, params))
    assert out.shape == (B, NUM_CLASSES)

    ref = reference_forward(x, raw)
    if not jnp.allclose(out, ref, atol=1e-2, rtol=1e-2):
        raise AssertionError(f"mismatch:\n{out}\nvs\n{ref}")
    print("KERNEL_OK")
</pallas_src>

<mosaic_0001>
module attributes {stable_mosaic.version = 11 : i64} {
  func.func @shallow_kernel(%arg0: memref<60x256xf32, #tpu.memory_space<vmem>>, %arg1: memref<8x60xf32, #tpu.memory_space<vmem>>, %arg2: memref<256x14xf32, #tpu.memory_space<vmem>>, %arg3: memref<32x14xf32, #tpu.memory_space<vmem>>, %arg4: memref<4x32xf32, #tpu.memory_space<vmem>>, %arg5: memref<14x2xf32, #tpu.memory_space<vmem>>, %arg6: memref<4x1xf32, #tpu.memory_space<vmem>>, %arg7: memref<4x2xf32, #tpu.memory_space<vmem>>) attributes {dimension_semantics = [], scalar_prefetch = 0 : i64, scratch_operands = 0 : i64, tpu.core_type = #tpu.core_type<tc>} {
    %c0 = arith.constant 0 : index
    %c0_0 = arith.constant 0 : index
    %0 = vector.load %arg1[%c0, %c0_0] : memref<8x60xf32, #tpu.memory_space<vmem>>, vector<8x60xf32>
    %c0_1 = arith.constant 0 : index
    %c0_2 = arith.constant 0 : index
    %1 = vector.load %arg0[%c0_1, %c0_2] : memref<60x256xf32, #tpu.memory_space<vmem>>, vector<60x256xf32>
    %cst = arith.constant dense<0.000000e+00> : vector<8x256xf32>
    %2 = tpu.matmul %0, %1, %cst {dimension_numbers = #tpu.dot_dimension_numbers<[1], [0], [0], [1], [0, 0, 1, 1], [], []>} : vector<8x60xf32>, vector<60x256xf32>, vector<8x256xf32> -> vector<8x256xf32>
    %3 = arith.mulf %2, %2 : vector<8x256xf32>
    %c0_3 = arith.constant 0 : index
    %c0_4 = arith.constant 0 : index
    %4 = vector.load %arg2[%c0_3, %c0_4] : memref<256x14xf32, #tpu.memory_space<vmem>>, vector<256x14xf32>
    %cst_5 = arith.constant dense<0.000000e+00> : vector<8x14xf32>
    %5 = tpu.matmul %3, %4, %cst_5 {dimension_numbers = #tpu.dot_dimension_numbers<[1], [0], [0], [1], [0, 0, 1, 1], [], []>} : vector<8x256xf32>, vector<256x14xf32>, vector<8x14xf32> -> vector<8x14xf32>
    %cst_6 = arith.constant 9.99999997E-7 : f32
    %6 = vector.broadcast %cst_6 : f32 to vector<8x14xf32>
    %7 = arith.maximumf %5, %6 : vector<8x14xf32>
    %8 = math.log %7 : vector<8x14xf32>
    %9 = tpu.concatenate %8, %8, %8, %8 in 0 : vector<8x14xf32>, vector<8x14xf32>, vector<8x14xf32>, vector<8x14xf32> -> vector<32x14xf32>
    %c0_7 = arith.constant 0 : index
    %c0_8 = arith.constant 0 : index
    %10 = vector.load %arg3[%c0_7, %c0_8] : memref<32x14xf32, #tpu.memory_space<vmem>>, vector<32x14xf32>
    %11 = arith.mulf %9, %10 : vector<32x14xf32>
    %c0_9 = arith.constant 0 : index
    %c0_10 = arith.constant 0 : index
    %12 = vector.load %arg4[%c0_9, %c0_10] : memref<4x32xf32, #tpu.memory_space<vmem>>, vector<4x32xf32>
    %cst_11 = arith.constant dense<0.000000e+00> : vector<4x14xf32>
    %13 = tpu.matmul %12, %11, %cst_11 {dimension_numbers = #tpu.dot_dimension_numbers<[1], [0], [0], [1], [0, 0, 1, 1], [], []>} : vector<4x32xf32>, vector<32x14xf32>, vector<4x14xf32> -> vector<4x14xf32>
    %c0_12 = arith.constant 0 : index
    %c0_13 = arith.constant 0 : index
    %14 = vector.load %arg5[%c0_12, %c0_13] : memref<14x2xf32, #tpu.memory_space<vmem>>, vector<14x2xf32>
    %cst_14 = arith.constant dense<0.000000e+00> : vector<4x2xf32>
    %15 = tpu.matmul %13, %14, %cst_14 {dimension_numbers = #tpu.dot_dimension_numbers<[1], [0], [0], [1], [0, 0, 1, 1], [], []>} : vector<4x14xf32>, vector<14x2xf32>, vector<4x2xf32> -> vector<4x2xf32>
    %c0_15 = arith.constant 0 : index
    %c0_16 = arith.constant 0 : index
    %16 = vector.load %arg6[%c0_15, %c0_16] : memref<4x1xf32, #tpu.memory_space<vmem>>, vector<4x1xf32>
    %17 = vector.broadcast %16 : vector<4x1xf32> to vector<4x2xf32>
    %18 = arith.addf %15, %17 : vector<4x2xf32>
    %c0_17 = arith.constant 0 : index
    %c0_18 = arith.constant 0 : index
    %19 = vector.load %arg7[%c0_17, %c0_18] : memref<4x2xf32, #tpu.memory_space<vmem>>, vector<4x2xf32>
    tpu.vector_store %arg7[%c0_17, %c0_18], %18 {strides = array<i32>} : memref<4x2xf32, #tpu.memory_space<vmem>>, vector<4x2xf32>,
    return
  }
}

</mosaic_0001>

<bundles_post_ra>
// kernel: shallowconvnet_forward.1
= control target key start
LH: loop header
LB: loop body
LE: loop exit
PB: predicated region body
PF: predicated region fallthrough
CT: control target
= control target key end

     0   :  { %vm47_vm0 = vcmask 1043456   ;;  %v480_v3 = vmov 0.0   ;;  %vm43_vm1 = vcmask 490496   ;;  %vm481_vm2 = vmmov 0   ;;  %s708_s0 = inlined_call_operand.vmem [shape: f32[60,256], index: 0, kind: input, shape index: {}]   ;;  %s709_s2 = inlined_call_operand.vmem [shape: f32[256,14], index: 2, kind: input, shape index: {}]   ;;  %s710_s1 = inlined_call_operand.vmem [shape: f32[8,60], index: 1, kind: input, shape index: {}]   ;;  %s711_s3 = inlined_call_operand.vmem [shape: f32[32,14], index: 3, kind: input, shape index: {}]   ;;  %s712_s4 = inlined_call_operand.vmem [shape: f32[4,32], index: 4, kind: input, shape index: {}]   ;;  %s713_s5 = inlined_call_operand.vmem [shape: f32[14,2], index: 5, kind: input, shape index: {}]   ;;  %s714_s6 = inlined_call_operand.vmem [shape: f32[4,1], index: 6, kind: input, shape index: {}]   ;;  %s715_s7 = inlined_call_operand.vmem [shape: f32[4,2], index: 7, kind: output, shape index: {}]  }
   0x1   :  { %v42_v0 = vld [vmem:[%s708_s0 + $0x78] sm:$0xf]  ;;  %v41_v1 = vld [vmem:[%s708_s0 + $0x70] sm:$0xf]  ;;  %v40_v2 = vld [vmem:[%s708_s0 + $0x68] sm:$0xff]  ;;  %118 = vmatprep.mubr.f32.mxu0 %v480_v3  ;;  %vm241_vm3 = vcmask 261120  }
   0x2   :  { %407 = vmatprep.subr.msk.mxu0 %vm47_vm0, %v42_v0  ;;  %v39_v4 = vld [vmem:[%s708_s0 + $0x60] sm:$0xff]  ;;  %v38_v5 = vld [vmem:[%s708_s0 + $0x58] sm:$0xff]  ;;  %v37_v6 = vld [vmem:[%s708_s0 + $0x50] sm:$0xff]  ;;  %vm327_vm4 = vcmask 1045504   ;;  %vm323_vm5 = vcmask 113664   ;;  %vm401_vm6 = vcmask 11264  }
   0x3   :  { %408 = vmatpush1.msk.msra.mxu0 %vm47_vm0, %v41_v1  ;;  %v36_v7 = vld [vmem:[%s708_s0 + $0x48] sm:$0xff]  ;;  %v35_v8 = vld [vmem:[%s708_s0 + $0x40] sm:$0xff]  ;;  %v34_v9 = vld [vmem:[%s708_s0 + $0x38] sm:$0xff] }
   0x4   :  { %72 = vmatprep.subr.mxu0 %v40_v2  ;;  %v158_v10 = vld [vmem:[%s709_s2 + $0xf8] sm:$0xff]  ;;  %v157_v12 = vld [vmem:[%s709_s2 + $0xf0] sm:$0xff]  ;;  %v156_v15 = vld [vmem:[%s709_s2 + $0xe8] sm:$0xff] }
   0x5   :  { %73 = vmatpush1.msra.mxu0 %v39_v4  ;;  %413 = vmatprep.subr.mxu1 %v158_v10  ;;  %v142_v11 = vld [vmem:[%s709_s2 + $0x78] sm:$0xff]  ;;  %v141_v13 = vld [vmem:[%s709_s2 + $0x70] sm:$0xff]  ;;  %v32_v16 = vld [vmem:[%s708_s0 + $0x28] sm:$0xff] }
   0x6   :  { %74 = vmatprep.subr.mxu0 %v38_v5  ;;  %v33_v14 = vld [vmem:[%s708_s0 + $0x30] sm:$0xff]  ;;  %414 = vmatpush3.msra.mxu1 %v142_v11  ;;  %v140_v17 = vld [vmem:[%s709_s2 + $0x68] sm:$0xff]  ;;  %v31_v18 = vld [vmem:[%s708_s0 + $0x20] sm:$0xff] }
   0x7   :  { %75 = vmatpush1.msra.mxu0 %v37_v6  ;;  %415 = vmatprep.subr.mxu1 %v157_v12  ;;  %v155_v19 = vld [vmem:[%s709_s2 + $0xe0] sm:$0xff]  ;;  %v30_v20 = vld [vmem:[%s708_s0 + $0x18] sm:$0xff]  ;;  %v29_v22 = vld [vmem:[%s708_s0 + $0x10] sm:$0xff] }
   0x8   :  { %76 = vmatprep.subr.mxu0 %v36_v7  ;;  %416 = vmatpush3.msra.mxu1 %v141_v13  ;;  %v139_v21 = vld [vmem:[%s709_s2 + $0x60] sm:$0xff]  ;;  %v154_v23 = vld [vmem:[%s709_s2 + $0xd8] sm:$0xff]  ;;  %v28_v24 = vld [vmem:[%s708_s0 + $0x8] sm:$0xff] }
   0x9   :  { %77 = vmatpush1.msra.mxu0 %v35_v8  ;;  %417 = vmatprep.subr.mxu1 %v156_v15  ;;  %v138_v25 = vld [vmem:[%s709_s2 + $0x58] sm:$0xff]  ;;  %v27_v26 = vld [vmem:[%s708_s0] sm:$0xff]  ;;  %v153_v27 = vld [vmem:[%s709_s2 + $0xd0] sm:$0xff]  ;;  %v482_v8 = vmov 0  }
   0xa   :  { %78 = vmatprep.subr.mxu0 %v34_v9  ;;  %418 = vmatpush3.msra.mxu1 %v140_v17  ;;  %v26_v28 = vld [vmem:[%s710_s1] sm:$0xff]  ;;  %v137_v29 = vld [vmem:[%s709_s2 + $0x50] sm:$0xff]  ;;  %v152_v30 = vld [vmem:[%s709_s2 + $0xc8] sm:$0xff] }
   0xb   :  { %79 = vmatpush1.msra.mxu0 %v33_v14  ;;  %419 = vmatprep.subr.mxu1 %v155_v19  ;;  %v136_v31 = vld [vmem:[%s709_s2 + $0x48] sm:$0xff]  ;;  %v151_v32 = vld [vmem:[%s709_s2 + $0xc0] sm:$0xff]  ;;  %v150_v34 = vld [vmem:[%s709_s2 + $0xb8] sm:$0xff] }
   0xc   :  { %80 = vmatprep.subr.mxu0 %v32_v16  ;;  %420 = vmatpush3.msra.mxu1 %v139_v21  ;;  %v135_v33 = vld [vmem:[%s709_s2 + $0x40] sm:$0xff]  ;;  %v134_v35 = vld [vmem:[%s709_s2 + $0x38] sm:$0xff]  ;;  %v149_v36 = vld [vmem:[%s709_s2 + $0xb0] sm:$0xff] }
   0xd   :  { %81 = vmatpush1.msra.mxu0 %v31_v18  ;;  %421 = vmatprep.subr.mxu1 %v154_v23  ;;  %v133_v37 = vld [vmem:[%s709_s2 + $0x30] sm:$0xff]  ;;  %v148_v38 = vld [vmem:[%s709_s2 + $0xa8] sm:$0xff]  ;;  %v147_v40 = vld [vmem:[%s709_s2 + $0xa0] sm:$0xff] }
   0xe   :  { %82 = vmatprep.subr.mxu0 %v30_v20  ;;  %422 = vmatpush3.msra.mxu1 %v138_v25  ;;  %v132_v39 = vld [vmem:[%s709_s2 + $0x28] sm:$0xff]  ;;  %v131_v41 = vld [vmem:[%s709_s2 + $0x20] sm:$0xff]  ;;  %v146_v42 = vld [vmem:[%s709_s2 + $0x98] sm:$0xff] }
   0xf   :  { %83 = vmatpush1.msra.mxu0 %v29_v22  ;;  %423 = vmatprep.subr.mxu1 %v153_v27  ;;  %v130_v43 = vld [vmem:[%s709_s2 + $0x18] sm:$0xff]  ;;  %v145_v44 = vld [vmem:[%s709_s2 + $0x90] sm:$0xff]  ;;  %v144_v46 = vld [vmem:[%s709_s2 + $0x88] sm:$0xff] }
  0x10   :  { %84 = vmatprep.subr.mxu0 %v28_v24  ;;  %424 = vmatpush3.msra.mxu1 %v137_v29  ;;  %v129_v45 = vld [vmem:[%s709_s2 + $0x10] sm:$0xff]  ;;  %v128_v47 = vld [vmem:[%s709_s2 + $0x8] sm:$0xff]  ;;  %v143_v48 = vld [vmem:[%s709_s2 + $0x80] sm:$0xff] }
  0x11   :  { %85 = vmatpush1.msra.mxu0 %v27_v26  ;;  %425 = vmatprep.subr.mxu1 %v152_v30  ;;  %v127_v49 = vld [vmem:[%s709_s2] sm:$0xff]  ;;  %v235_v59 = vld [vmem:[%s711_s3 + $0x18] sm:$0xff]  ;;  %v234_v61 = vld [vmem:[%s711_s3 + $0x10] sm:$0xff] }
  0x12   :  { %409 = vmatmul.mubr.msk.f32.vlgmr.msra.gmra.mxu0 %vm43_vm1, %v26_v28  ;;  %456 = vmatprep.subr.mxu0 %v480_v3  ;;  %v233_v63 = vld [vmem:[%s711_s3 + $0x8] sm:$0xff]  ;;  %v232_v1 = vld [vmem:[%s711_s3] sm:$0xff] }
  0x13   :  { %426 = vmatpush3.msra.mxu1 %v136_v31  ;;  %464 = vmatprep.mubr.msk.f32.mxu0 %vm481_vm2, %v480_v3  ;;  %v240_v5 = vld [vmem:[%s712_s4] sm:$0xf]  ;;  %v316_v6 = vld [vmem:[%s713_s5 + $0x8] sm:$0x3f] }
  0x14   :  { %427 = vmatprep.subr.mxu1 %v151_v32  ;;  %v315_v7 = vld [vmem:[%s713_s5] sm:$0xff]  ;;  %477 = vset.pattern.permute.xlu0 %v482_v8 }
  0x15   :  { %428 = vmatpush3.msra.mxu1 %v135_v33  ;;  %v317_v9 = vld [vmem:[%s714_s6] sm:$0xf] }
  0x16   :  { %429 = vmatprep.subr.mxu1 %v150_v34  ;;  %320 = vperm.xlu0 %477, %v317_v9  }
  0x17   :  { %430 = vmatpush3.msra.mxu1 %v134_v35 }
  0x18   :  { %431 = vmatprep.subr.mxu1 %v149_v36 }
  0x19   :  { %432 = vmatpush3.msra.mxu1 %v133_v37 }
  0x1a   :  { %433 = vmatprep.subr.mxu1 %v148_v38 }
  0x1b   :  { %434 = vmatpush3.msra.mxu1 %v132_v39 }
  0x1c   :  { %435 = vmatprep.subr.mxu1 %v147_v40 }
  0x1d   :  { %436 = vmatpush3.msra.mxu1 %v131_v41 }
  0x1e   :  { %437 = vmatprep.subr.mxu1 %v146_v42 }
  0x1f   :  { %438 = vmatpush3.msra.mxu1 %v130_v43 }
  0x20   :  { %439 = vmatprep.subr.mxu1 %v145_v44 }
  0x21   :  { %440 = vmatpush3.msra.mxu1 %v129_v45 }
  0x22   :  { %441 = vmatprep.subr.mxu1 %v144_v46 }
  0x23   :  { %442 = vmatpush3.msra.mxu1 %v128_v47 }
  0x24   :  { %443 = vmatprep.subr.mxu1 %v143_v48 }
  0x25   :  { %444 = vmatpush3.msra.mxu1 %v127_v49 }
  0x91   :  { %v321_v12 = vpop.permute.xlu0 %320 }
  0xd2   :  { %v120_v50 = vpop.f32.mrf.mxu0 }
  0xd3   :  { %v125_v53 = vmul.f32 %v120_v50, %v120_v50 }
  0xd4   :  { %v122_v51 = vpop.f32.mrf.mxu0 }
  0xd5   :  { %v126_v52 = vmul.f32 %v122_v51, %v122_v51 }
  0xd7   :  { %223 = vmatprep.mubr.f32.mxu1 %v126_v52 }
  0xd8   :  { %224 = vmatmul.mubr.f32.vlgmr.msra.gmra.mxu1 %v125_v53 }
 0x198   :  { %v445_v54 = vpop.f32.mrf.mxu1 }
 0x19a   :  { %v446_v55 = vpop.f32.mrf.mxu1 }
 0x19b   :  { %v447_v56 = vadd.f32 %v446_v55, %v445_v54 }
 0x19d   :  { %v229_v57 = vmax.f32 %v447_v56, 1e-06 }
 0x19f   :  { %478 = vlog2.f32 %v229_v57 }
 0x1ac   :  { %v479_v58 = vpop.eup %478 }
 0x1ad   :  { %v231_v60 = vmul.f32 0.6931472, %v479_v58 }
 0x1af   :  { %v239_v62 = vmul.f32 %v235_v59, %v231_v60  ;;  %v238_v0 = vmul.f32 %v234_v61, %v231_v60  ;;  %v237_v2 = vmul.f32 %v233_v63, %v231_v60  ;;  %v236_v4 = vmul.f32 %v232_v1, %v231_v60 }
 0x1b1   :  { %457 = vmatpush3.msra.mxu0 %v239_v62 }
 0x1b2   :  { %458 = vmatprep.subr.mxu0 %v480_v3 }
 0x1b3   :  { %459 = vmatpush3.msra.mxu0 %v238_v0 }
 0x1b4   :  { %460 = vmatprep.subr.mxu0 %v480_v3 }
 0x1b5   :  { %461 = vmatpush3.msra.mxu0 %v237_v2 }
 0x1b6   :  { %462 = vmatprep.subr.mxu0 %v480_v3 }
 0x1b7   :  { %463 = vmatpush3.msra.mxu0 %v236_v4 }
 0x1b8   :  { %465 = vmatmul.mubr.msk.f32.vlgmr.msra.gmra.mxu0 %vm241_vm3, %v240_v5  ;;  %467 = vmatprep.subr.mxu0 %v480_v3 }
 0x1b9   :  { %468 = vmatpush3.msk.msra.mxu0 %vm327_vm4, %v316_v6  ;;  %471 = vmatprep.mubr.msk.f32.mxu0 %vm481_vm2, %v480_v3 }
 0x1ba   :  { %469 = vmatprep.subr.mxu0 %v480_v3 }
 0x1bb   :  { %470 = vmatpush3.msra.mxu0 %v315_v7 }
 0x278   :  { %v311_v10 = vpop.f32.mrf.mxu0 }
 0x279   :  { %472 = vmatmul.mubr.msk.f32.vlgmr.msra.gmra.mxu0 %vm323_vm5, %v311_v10 }
 0x27a   :  { %v466_v11 = vpop.f32.mrf.mxu0 }
 0x339   :  { %v397_v13 = vpop.f32.mrf.mxu0 }
 0x33a   :  { %v398_v14 = vadd.f32 %v397_v13, %v321_v12 }
 0x33b   :  { %v473_v15 = vpop.f32.mrf.mxu0 }
 0x33c   :  { %402 = vst.msk [vmem:[%s715_s7] sm:$0xf] %vm401_vm6, %v398_v14 }

</bundles_post_ra>
